<compile_context>
chip_gen: v7x
topology: tpu7x:2x2x1
jax: 0.10.0
libtpu: 0.0.40
codegen_flags: <defaults>
</compile_context>

<pallas_src>
import functools

import jax
import jax.numpy as jnp
import numpy as np
from jax.experimental import pallas as pl
from jax.experimental.pallas import tpu as pltpu


def _ffn_kernel(x_ref, w1_ref, b1_ref, w2_ref, b2_ref, g_ref, beta_ref, o_ref,
                *, eps):
    # x_ref   : (BB, S, E) f32   input batch tile
    # w1_ref  : (E, F)     bf16  fc1 weight (VMEM-resident across grid steps)
    # b1_ref  : (BB, S, F) bf16  fc1 "bias" (gaussian noise, per PyTorch semantics)
    # w2_ref  : (F, E)     bf16  fc2 weight (resident)
    # b2_ref  : (BB, S, E) bf16  fc2 "bias"
    # g_ref   : (S, E)     f32   LayerNorm gamma
    # beta_ref: (S, E)     f32   LayerNorm beta
    # o_ref   : (BB, S, E) f32   output tile
    BB, S, E = x_ref.shape
    F = w1_ref.shape[1]

    x = x_ref[...]                                   # (BB, S, E) f32
    # S is a multiple of 8 and E a multiple of 128 here, so folding batch into
    # sublanes is a free relayout (no VMEM copies).
    x2d = x.reshape(BB * S, E)

    # fc1: bf16 MXU operands, f32 accumulate; bias + ReLU in f32 (VPU).
    h = jnp.dot(x2d.astype(jnp.bfloat16), w1_ref[...],
                preferred_element_type=jnp.float32)
    h = jnp.maximum(
        h + b1_ref[...].reshape(BB * S, F).astype(jnp.float32), 0.0)

    # fc2 + bias + residual (residual/elementwise in f32).
    y = jnp.dot(h.astype(jnp.bfloat16), w2_ref[...],
                preferred_element_type=jnp.float32)
    y = (y + b2_ref[...].reshape(BB * S, E).astype(jnp.float32)
         ).reshape(BB, S, E) + x

    # LayerNorm over the whole (seq_len, d_embed) plane, per batch element
    # (matches nn.LayerNorm([seq_len, d_embed]) with biased variance).
    mean = jnp.mean(y, axis=(1, 2), keepdims=True)            # (BB, 1, 1)
    cent = y - mean
    var = jnp.mean(cent * cent, axis=(1, 2), keepdims=True)
    inv = jax.lax.rsqrt(var + eps)
    o_ref[...] = (cent * inv * g_ref[...][None] + beta_ref[...][None]).astype(
        o_ref.dtype)


def _pick_block_b(batch, seq_len):
    """Largest batch-tile that (a) divides batch, (b) keeps >= 2 grid steps
    (so the 'parallel' axis can use both v7x TensorCores), and (c) stops once
    block_b * seq_len reaches ~256 rows (fills the 256-wide MXU)."""
    target_rows = 256
    cap = min(max(batch // 2, 1), 128)
    best = 1
    for bb in range(1, cap + 1):
        if batch % bb == 0:
            best = bb
            if bb * seq_len >= target_rows:
                break
    return best


def feed_forward(x, w1, b1, w2, b2, gamma, beta, *, eps=1e-5, block_b=None):
    """Fused Pallas implementation of FeedForward.forward(x)."""
    B, S, E = x.shape
    F = w1.shape[1]
    if block_b is None:
        block_b = _pick_block_b(B, S)
    nb = B // block_b

    # bf16 for MXU operands and the large noise-bias streams (halves DMA bytes);
    # LayerNorm affine params stay f32.
    w1 = w1.astype(jnp.bfloat16)
    w2 = w2.astype(jnp.bfloat16)
    b1 = b1.astype(jnp.bfloat16)
    b2 = b2.astype(jnp.bfloat16)
    gamma = gamma.astype(jnp.float32)
    beta = beta.astype(jnp.float32)

    flops = 4 * B * S * E * F                       # two matmuls, 2*M*N*K each
    bytes_accessed = (
        B * S * E * 4                               # x (f32)
        + E * F * 2 + F * E * 2                     # W1, W2 (bf16)
        + B * S * F * 2 + B * S * E * 2             # bias1, bias2 (bf16)
        + 2 * S * E * 4                             # gamma, beta (f32)
        + B * S * E * 4                             # output (f32)
    )

    kernel = functools.partial(_ffn_kernel, eps=eps)
    return pl.pallas_call(
        kernel,
        out_shape=jax.ShapeDtypeStruct((B, S, E), x.dtype),
        grid=(nb,),
        in_specs=[
            pl.BlockSpec((block_b, S, E), lambda b: (b, 0, 0)),   # x
            pl.BlockSpec((E, F),          lambda b: (0, 0)),      # W1 (resident)
            pl.BlockSpec((block_b, S, F), lambda b: (b, 0, 0)),   # bias1
            pl.BlockSpec((F, E),          lambda b: (0, 0)),      # W2 (resident)
            pl.BlockSpec((block_b, S, E), lambda b: (b, 0, 0)),   # bias2
            pl.BlockSpec((S, E),          lambda b: (0, 0)),      # gamma
            pl.BlockSpec((S, E),          lambda b: (0, 0)),      # beta
        ],
        out_specs=pl.BlockSpec((block_b, S, E), lambda b: (b, 0, 0)),
        compiler_params=pltpu.CompilerParams(
            dimension_semantics=("parallel",),      # megacore-shard batch tiles
        ),
        cost_estimate=pl.CostEstimate(
            flops=flops, transcendentals=B, bytes_accessed=bytes_accessed),
    )(x, w1, b1, w2, b2, gamma, beta)


def _reference_f32(x, w1, b1, w2, b2, gamma, beta, eps=1e-5):
    """Pure-JAX, full-f32 reference reproducing the PyTorch forward."""
    h = jnp.maximum(
        jnp.dot(x, w1, precision=jax.lax.Precision.HIGHEST) + b1, 0.0)
    y = jnp.dot(h, w2, precision=jax.lax.Precision.HIGHEST) + b2 + x
    mean = y.mean(axis=(1, 2), keepdims=True)
    var = ((y - mean) ** 2).mean(axis=(1, 2), keepdims=True)
    return (y - mean) / jnp.sqrt(var + eps) * gamma + beta


def _reference_bf16(x, w1, b1, w2, b2, gamma, beta, eps=1e-5):
    """Reference with the kernel's mixed precision (bf16 MXU operands,
    f32 accumulation / elementwise) for a tight numerical comparison."""
    bf = jnp.bfloat16
    h = jnp.dot(x.astype(bf), w1.astype(bf), preferred_element_type=jnp.float32)
    h = jnp.maximum(h + b1.astype(bf).astype(jnp.float32), 0.0)
    y = jnp.dot(h.astype(bf), w2.astype(bf), preferred_element_type=jnp.float32)
    y = y + b2.astype(bf).astype(jnp.float32) + x
    mean = y.mean(axis=(1, 2), keepdims=True)
    var = ((y - mean) ** 2).mean(axis=(1, 2), keepdims=True)
    return (y - mean) / jnp.sqrt(var + eps) * gamma + beta


if __name__ == "__main__":
    S, E, F = 8, 128, 256        # seq_len, d_embed, d_ff (module default)
    eps = 1e-5

    for B in (2, 64):            # small demo batch + a batch that tiles block_b>1
        key = jax.random.PRNGKey(0)
        k_x, k_w1, k_w2, k_b1, k_b2 = jax.random.split(key, 5)

        x = jax.random.normal(k_x, (B, S, E), dtype=jnp.float32)
        w1 = jax.random.normal(k_w1, (E, F), dtype=jnp.float32)   # FCLayer(d_embed, d_ff)
        w2 = jax.random.normal(k_w2, (F, E), dtype=jnp.float32)   # FCLayer(d_ff, d_embed)
        # PyTorch draws torch.randn(x.size()) as a fresh bias inside each forward;
        # the equivalent gaussian-noise biases are generated here deterministically.
        b1 = jax.random.normal(k_b1, (B, S, F), dtype=jnp.float32)
        b2 = jax.random.normal(k_b2, (B, S, E), dtype=jnp.float32)
        gamma = jnp.ones((S, E), dtype=jnp.float32)   # LayerNorm default affine init
        beta = jnp.zeros((S, E), dtype=jnp.float32)

        out = feed_forward(x, w1, b1, w2, b2, gamma, beta, eps=eps)
        jax.block_until_ready(out)

        # Tight check against a reference with matching (bf16-MXU) precision.
        ref_bf16 = _reference_bf16(x, w1, b1, w2, b2, gamma, beta, eps=eps)
        np.testing.assert_allclose(np.asarray(out), np.asarray(ref_bf16),
                                   rtol=2e-3, atol=2e-3)
        # Looser check against the faithful full-f32 PyTorch-equivalent math.
        ref_f32 = _reference_f32(x, w1, b1, w2, b2, gamma, beta, eps=eps)
        np.testing.assert_allclose(np.asarray(out), np.asarray(ref_f32),
                                   rtol=5e-2, atol=5e-2)

    print("KERNEL_OK")
</pallas_src>

<mosaic_0001>
module attributes {stable_mosaic.version = 11 : i64} {
  func.func @_ffn_kernel(%arg0: i32, %arg1: memref<1x8x128xf32, #tpu.memory_space<vmem>>, %arg2: memref<128x256xbf16, #tpu.memory_space<vmem>>, %arg3: memref<1x8x256xbf16, #tpu.memory_space<vmem>>, %arg4: memref<256x128xbf16, #tpu.memory_space<vmem>>, %arg5: memref<1x8x128xbf16, #tpu.memory_space<vmem>>, %arg6: memref<8x128xf32, #tpu.memory_space<vmem>>, %arg7: memref<8x128xf32, #tpu.memory_space<vmem>>, %arg8: memref<1x8x128xf32, #tpu.memory_space<vmem>>) attributes {dimension_semantics = [#tpu.dimension_semantics<parallel>], iteration_bounds = array<i64: 2>, scalar_prefetch = 0 : i64, scratch_operands = 0 : i64, tpu.core_type = #tpu.core_type<tc>, window_params = [{transform_indices = @transform_0, window_bounds = array<i64: 1, 8, 128>}, {pipeline_mode = #tpu.pipeline_mode<synchronous>, transform_indices = @transform_1, window_bounds = array<i64: 128, 256>}, {transform_indices = @transform_2, window_bounds = array<i64: 1, 8, 256>}, {pipeline_mode = #tpu.pipeline_mode<synchronous>, transform_indices = @transform_3, window_bounds = array<i64: 256, 128>}, {transform_indices = @transform_4, window_bounds = array<i64: 1, 8, 128>}, {pipeline_mode = #tpu.pipeline_mode<synchronous>, transform_indices = @transform_5, window_bounds = array<i64: 8, 128>}, {pipeline_mode = #tpu.pipeline_mode<synchronous>, transform_indices = @transform_6, window_bounds = array<i64: 8, 128>}, {transform_indices = @transform_7, window_bounds = array<i64: 1, 8, 128>}]} {
    %c0 = arith.constant 0 : index
    %c0_0 = arith.constant 0 : index
    %c0_1 = arith.constant 0 : index
    %0 = vector.load %arg1[%c0, %c0_0, %c0_1] : memref<1x8x128xf32, #tpu.memory_space<vmem>>, vector<1x8x128xf32>
    %1 = vector.shape_cast %0 : vector<1x8x128xf32> to vector<8x128xf32>
    %2 = arith.truncf %1 : vector<8x128xf32> to vector<8x128xbf16>
    %c0_2 = arith.constant 0 : index
    %c0_3 = arith.constant 0 : index
    %3 = vector.load %arg2[%c0_2, %c0_3] : memref<128x256xbf16, #tpu.memory_space<vmem>>, vector<128x256xbf16>
    %cst = arith.constant dense<0.000000e+00> : vector<8x256xf32>
    %4 = tpu.matmul %2, %3, %cst {dimension_numbers = #tpu.dot_dimension_numbers<[1], [0], [0], [1], [0, 0, 1, 1], [], []>} : vector<8x128xbf16>, vector<128x256xbf16>, vector<8x256xf32> -> vector<8x256xf32>
    %c0_4 = arith.constant 0 : index
    %c0_5 = arith.constant 0 : index
    %c0_6 = arith.constant 0 : index
    %5 = vector.load %arg3[%c0_4, %c0_5, %c0_6] : memref<1x8x256xbf16, #tpu.memory_space<vmem>>, vector<1x8x256xbf16>
    %6 = vector.shape_cast %5 : vector<1x8x256xbf16> to vector<8x256xbf16>
    %7 = arith.extf %6 : vector<8x256xbf16> to vector<8x256xf32>
    %8 = arith.addf %4, %7 : vector<8x256xf32>
    %cst_7 = arith.constant 0.000000e+00 : f32
    %9 = vector.broadcast %cst_7 : f32 to vector<8x256xf32>
    %10 = arith.maximumf %8, %9 : vector<8x256xf32>
    %11 = arith.truncf %10 : vector<8x256xf32> to vector<8x256xbf16>
    %c0_8 = arith.constant 0 : index
    %c0_9 = arith.constant 0 : index
    %12 = vector.load %arg4[%c0_8, %c0_9] : memref<256x128xbf16, #tpu.memory_space<vmem>>, vector<256x128xbf16>
    %cst_10 = arith.constant dense<0.000000e+00> : vector<8x128xf32>
    %13 = tpu.matmul %11, %12, %cst_10 {dimension_numbers = #tpu.dot_dimension_numbers<[1], [0], [0], [1], [0, 0, 1, 1], [], []>} : vector<8x256xbf16>, vector<256x128xbf16>, vector<8x128xf32> -> vector<8x128xf32>
    %c0_11 = arith.constant 0 : index
    %c0_12 = arith.constant 0 : index
    %c0_13 = arith.constant 0 : index
    %14 = vector.load %arg5[%c0_11, %c0_12, %c0_13] : memref<1x8x128xbf16, #tpu.memory_space<vmem>>, vector<1x8x128xbf16>
    %15 = vector.shape_cast %14 : vector<1x8x128xbf16> to vector<8x128xbf16>
    %16 = arith.extf %15 : vector<8x128xbf16> to vector<8x128xf32>
    %17 = arith.addf %13, %16 : vector<8x128xf32>
    %18 = vector.shape_cast %17 : vector<8x128xf32> to vector<1x8x128xf32>
    %19 = arith.addf %18, %0 : vector<1x8x128xf32>
    %cst_14 = arith.constant dense<0.000000e+00> : vector<1xf32>
    %20 = vector.multi_reduction <add>, %19, %cst_14 [1, 2] : vector<1x8x128xf32> to vector<1xf32>
    %21 = vector.shape_cast %20 : vector<1xf32> to vector<1x1x1xf32>
    %cst_15 = arith.constant 1.024000e+03 : f32
    %22 = vector.broadcast %cst_15 : f32 to vector<1x1x1xf32>
    %23 = arith.divf %21, %22 : vector<1x1x1xf32>
    %24 = vector.broadcast %23 : vector<1x1x1xf32> to vector<1x8x128xf32>
    %25 = arith.subf %19, %24 : vector<1x8x128xf32>
    %26 = arith.mulf %25, %25 : vector<1x8x128xf32>
    %cst_16 = arith.constant dense<0.000000e+00> : vector<1xf32>
    %27 = vector.multi_reduction <add>, %26, %cst_16 [1, 2] : vector<1x8x128xf32> to vector<1xf32>
    %28 = vector.shape_cast %27 : vector<1xf32> to vector<1x1x1xf32>
    %cst_17 = arith.constant 1.024000e+03 : f32
    %29 = vector.broadcast %cst_17 : f32 to vector<1x1x1xf32>
    %30 = arith.divf %28, %29 : vector<1x1x1xf32>
    %cst_18 = arith.constant 9.99999974E-6 : f32
    %31 = vector.broadcast %cst_18 : f32 to vector<1x1x1xf32>
    %32 = arith.addf %30, %31 : vector<1x1x1xf32>
    %33 = math.rsqrt %32 : vector<1x1x1xf32>
    %34 = vector.broadcast %33 : vector<1x1x1xf32> to vector<1x8x128xf32>
    %35 = arith.mulf %25, %34 : vector<1x8x128xf32>
    %c0_19 = arith.constant 0 : index
    %c0_20 = arith.constant 0 : index
    %36 = vector.load %arg6[%c0_19, %c0_20] : memref<8x128xf32, #tpu.memory_space<vmem>>, vector<8x128xf32>
    %37 = vector.shape_cast %36 : vector<8x128xf32> to vector<1x8x128xf32>
    %38 = arith.mulf %35, %37 : vector<1x8x128xf32>
    %c0_21 = arith.constant 0 : index
    %c0_22 = arith.constant 0 : index
    %39 = vector.load %arg7[%c0_21, %c0_22] : memref<8x128xf32, #tpu.memory_space<vmem>>, vector<8x128xf32>
    %40 = vector.shape_cast %39 : vector<8x128xf32> to vector<1x8x128xf32>
    %41 = arith.addf %38, %40 : vector<1x8x128xf32>
    %c0_23 = arith.constant 0 : index
    %c0_24 = arith.constant 0 : index
    %c0_25 = arith.constant 0 : index
    %42 = vector.load %arg8[%c0_23, %c0_24, %c0_25] : memref<1x8x128xf32, #tpu.memory_space<vmem>>, vector<1x8x128xf32>
    tpu.vector_store %arg8[%c0_23, %c0_24, %c0_25], %41 {strides = array<i32>} : memref<1x8x128xf32, #tpu.memory_space<vmem>>, vector<1x8x128xf32>,
    return
  }
  func.func @transform_0(%arg0: i32) -> (i32, i32, i32) {
    %c0_i32 = arith.constant 0 : i32
    %c0_i32_0 = arith.constant 0 : i32
    %c0_i32_1 = arith.constant 0 : i32
    return %arg0, %c0_i32, %c0_i32_0 : i32, i32, i32
  }
  func.func @transform_1(%arg0: i32) -> (i32, i32) {
    %c0_i32 = arith.constant 0 : i32
    %c0_i32_0 = arith.constant 0 : i32
    %c0_i32_1 = arith.constant 0 : i32
    return %c0_i32, %c0_i32_0 : i32, i32
  }
  func.func @transform_2(%arg0: i32) -> (i32, i32, i32) {
    %c0_i32 = arith.constant 0 : i32
    %c0_i32_0 = arith.constant 0 : i32
    %c0_i32_1 = arith.constant 0 : i32
    return %arg0, %c0_i32, %c0_i32_0 : i32, i32, i32
  }
  func.func @transform_3(%arg0: i32) -> (i32, i32) {
    %c0_i32 = arith.constant 0 : i32
    %c0_i32_0 = arith.constant 0 : i32
    %c0_i32_1 = arith.constant 0 : i32
    return %c0_i32, %c0_i32_0 : i32, i32
  }
  func.func @transform_4(%arg0: i32) -> (i32, i32, i32) {
    %c0_i32 = arith.constant 0 : i32
    %c0_i32_0 = arith.constant 0 : i32
    %c0_i32_1 = arith.constant 0 : i32
    return %arg0, %c0_i32, %c0_i32_0 : i32, i32, i32
  }
  func.func @transform_5(%arg0: i32) -> (i32, i32) {
    %c0_i32 = arith.constant 0 : i32
    %c0_i32_0 = arith.constant 0 : i32
    %c0_i32_1 = arith.constant 0 : i32
    return %c0_i32, %c0_i32_0 : i32, i32
  }
  func.func @transform_6(%arg0: i32) -> (i32, i32) {
    %c0_i32 = arith.constant 0 : i32
    %c0_i32_0 = arith.constant 0 : i32
    %c0_i32_1 = arith.constant 0 : i32
    return %c0_i32, %c0_i32_0 : i32, i32
  }
  func.func @transform_7(%arg0: i32) -> (i32, i32, i32) {
    %c0_i32 = arith.constant 0 : i32
    %c0_i32_0 = arith.constant 0 : i32
    %c0_i32_1 = arith.constant 0 : i32
    return %arg0, %c0_i32, %c0_i32_0 : i32, i32, i32
  }
}

</mosaic_0001>

<bundles_post_ra>
// kernel: tpu_custom_call.1
= control target key start
LH: loop header
LB: loop body
LE: loop exit
PB: predicated region body
PF: predicated region fallthrough
CT: control target
= control target key end

     0   :  { %s1674_s0 = inlined_call_operand.hbm [shape: f32[2,8,128], index: 0, kind: input, shape index: {}]   ;;  %s1675_s1 = inlined_call_operand.hbm [shape: bf16[128,256], index: 1, kind: input, shape index: {}]   ;;  %s1676_s2 = inlined_call_operand.hbm [shape: bf16[2,8,256], index: 2, kind: input, shape index: {}]   ;;  %s1677_s3 = inlined_call_operand.hbm [shape: bf16[256,128], index: 3, kind: input, shape index: {}]   ;;  %s1678_s4 = inlined_call_operand.vmem [shape: bf16[2,8,128], index: 4, kind: input, shape index: {}]   ;;  %s1679_s5 = inlined_call_operand.vmem [shape: f32[8,128], index: 5, kind: input, shape index: {}]   ;;  %s1680_s6 = inlined_call_operand.hbm [shape: f32[8,128], index: 6, kind: input, shape index: {}]   ;;  %s1681_s7 = inlined_call_operand.hbm [shape: f32[2,8,128], index: 7, kind: output, shape index: {}]  }
   0x1   :  { %1697 = sst [smem:[#allocation24_spill]] %s1674_s0 }
   0x2   :  { %1698 = sst [smem:[#allocation25_spill]] %s1675_s1 }
   0x3   :  { %12 = vsyncpa [#allocation3], 0 }
   0x4   :  { %14 = vsyncpa [#allocation3 + $0x1], 0 }
   0x5   :  { %15 = vsyncpa [#allocation6], 0 }
   0x6   :  { %16 = vsyncpa [#allocation10], 0 }
   0x7   :  { %17 = vsyncpa [#allocation4], 0 }
   0x8   :  { %19 = vsyncpa [#allocation4 + $0x1], 0  ;;  %s1366_s24 = smov 0   ;;  %s1368_s25 = smov 0  }
   0x9   :  { %s1370_s26 = smov 0   ;;  %s1372_s27 = smov 0  }
   0xa LB: > { %1699 = sst [smem:[#allocation18_spill]] %s1301_s24  ;;  %s1387_s28 = sadd.s32 4294967295, %s1313_s27   ;;  %s1313_s27 = sphi %s1372_s27, %s1733_s27   ;;  %s1309_s26 = sphi %s1370_s26, %s1735_s26   ;;  %s1305_s25 = sphi %s1368_s25, %s1737_s25   ;;  %s1301_s24 = sphi %s1366_s24, %s1736_s24  }
   0xb   : > { %1700 = sst [smem:[#allocation19_spill]] %s1309_s26  ;;  %s880_s29 = sadd.s32 4294967294, %s1313_s27  }
   0xc   : > { %1701 = sst [smem:[#allocation20_spill]] %s1313_s27  ;;  %p45_p0 = scmp.ne.s32.totalorder %s1305_s25, %s1301_s24 }
   0xd   : > { %p1682_p1 = scmp.eq.s32.totalorder %s1387_s28, 0  ;;  %p211_p3 = scmp.eq.s32.totalorder %s880_s29, 1 }
   0xe   : > { %p881_p5 = scmp.ge.s32.totalorder %s1313_s27, 1  ;;  %p218_p7 = scmp.lt.s32.totalorder %s1313_s27, 3 }
   0xf   : > { %p1396_p4 = por %p1682_p1, %p45_p0  ;;  %p1401_p6 = por %p211_p3, %p45_p0 }
  0x10   : > { %p1406_p8 = pnand %p881_p5, %p218_p7  ;;  %s1315_s10 = smov [#allocation5]  }
  0x11   : > { %s1702_s30 = scalar_select %p1396_p4, 1, 0 }
  0x12   : > { %s1703_s8 = scalar_select %p1401_p6, 1, 0 }
  0x13   : > { %s1705_s9 = scalar_select %p1406_p8, 1, 0 }
  0x14   : > { %1704 = sst [smem:[#allocation21_spill]] %s1703_s8  ;;  %s230_s11 = sshll.u32 %s1315_s10, 4  ;;  %s1410_s11 = int_to_ptr.vmem [resolvable:$true] %s230_s11 }
  0x15   : > { %p976_p9 = pneg %p1406_p8  ;;  %s1422_s13 = sadd.s32 1, %s1313_s27  }
  0x16   : > { %1707 = sst [smem:[#allocation22_spill]] %s1422_s13  ;;  %s32_s14 = sadd.s32 1, %s1309_s26 }
  0x17   : > { %p1417_p11 = pnand %p976_p9, %p1682_p1  ;;  %s29_s15 = ssub.s32 %s1313_s27, %s1422_s13 }
  0x18   : > { %s1708_s1 = sld [smem:[#allocation25_spill]] }
  0x19   : > { %s1706_s12 = scalar_select %p1417_p11, 1, 0 }
  0x1a   : > { %p1435_p13 = pneg %p1417_p11 }
  0x1e   : > { %s1087_s18 = scalar_lea.hbm %s1708_s1, 2048 }
  0x1f   : > { %p1088_p12 = scmp.ne.s32.totalorder %s1708_s1, %s1087_s18  ;;  %p1094_p5 = scmp.lt.u32.totalorder %s1087_s18, %s1708_s1 }
  0x21   : > { %p1090_p0 = pnand %p1435_p13, %p1088_p12 }
  0x23   : > { %p1091_p3 = pneg %p1090_p0 }
  0x25   : > { %p1096_p7 = pnand %p1094_p5, %p1091_p3 }
  0x27   : > { %1099 = shalt.err (!%p1096_p7)
}
  0x28   : > { %s1100_s29 = scalar_lea.vmem %s1410_s11, 2048  ;;  %p1108_p2 = scmp.lt.s32.totalorder %s1410_s11, %s1410_s11 }
  0x29   : > { %p1101_p9 = scmp.ne.s32.totalorder %s1410_s11, %s1100_s29  ;;  %p1109_p6 = scmp.lt.s32.totalorder %s1100_s29, %s1100_s29 }
  0x2b   : > { %p1103_p10 = pnand %p1101_p9, %p1435_p13  ;;  %p1110_p12 = por %p1109_p6, %p1108_p2 }
  0x2d   : > { %p1104_p1 = pneg %p1103_p10 }
  0x2f   : > { %p1111_p0 = pnand %p1110_p12, %p1104_p1 }
  0x31   : > { %1114 = shalt.err (!%p1111_p0)
}
  0x32   : > { %s1316_s10 = smov 128   ;;  %s1317_s16 = smov 8  }
  0x33   : > { %979 = dma.hbm_to_vmem [thread:$0]  (!%p1417_p11), %s1708_s1, 2048, %s1410_s11, [#allocation6], %s1316_s10, %s1316_s10, %s1317_s16  }
  0x34   : > { %p30_p1 = scmp.eq.s32.totalorder %s29_s15, 0  ;;  %p39_p2 = scmp.ne.s32.totalorder %s1309_s26, %s1305_s25 }
  0x35   : > { %p40_p6 = scmp.eq.s32.totalorder %s1313_s27, 0  ;;  %p1000_p10 = scmp.lt.s32.totalorder %s1313_s27, 2 }
  0x36   : > { %s1461_s19 = scalar_select %p30_p1, %s1309_s26, %s32_s14  }
  0x37   : > { %p41_p3 = por %p40_p6, %p39_p2  ;;  %p1711_p5 = scmp.eq.s32.totalorder %s1387_s28, 1 }
  0x38   : > { %1710 = sst [smem:[#allocation23_spill]] %s1461_s19  ;;  %s271_s22 = sand.u32 1, %s1313_s27  }
  0x39   : > { %p1465_p7 = por %p1711_p5, %p39_p2  ;;  %s273_s23 = sand.u32 1, %s1309_s26  }
  0x3a   : > { %s1471_s29 = sshll.u32 %s273_s23, 3  ;;  %s887_s13 = sshll.u32 %s1313_s27, 7 }
  0x3b   : > { %s1712_s20 = scalar_select %p1465_p7, 1, 0 }
  0x3c   : > { %s1713_s0 = sld [smem:[#allocation24_spill]]  ;;  %s275_s14 = scalar_lea.vmem [#allocation2], %s1471_s29 }
  0x3d   : > { %s282_s10 = sshll.u32 %s275_s14, 4  ;;  %p1482_p9 = pnand %p1000_p10, %p41_p3  ;;  %s1480_s10 = int_to_ptr.vmem [resolvable:$true] %s282_s10 }
  0x3e   : > { %s1489_s17 = scalar_lea.hbm %s1676_s2, %s887_s13  ;;  %s1491_s11 = scalar_lea.sflag [#allocation3], %s271_s22 }
  0x3f   : > { %s1714_s16 = scalar_select %p1482_p9, 1, 0 }
  0x40   : > { %p1692_p0 = pneg %p1482_p9 }
  0x42   : > { %s1477_s15 = scalar_lea.hbm %s1713_s0, %s887_s13  ;;  %s1120_s26 = scalar_lea.hbm %s1713_s0, 256 }
  0x43   : > { %s1115_s1 = scalar_lea.hbm %s1477_s15, 128  ;;  %p1121_p6 = scmp.lt.u32.totalorder %s1477_s15, %s1713_s0 }
  0x44   : > { %p1116_p12 = scmp.ne.s32.totalorder %s1477_s15, %s1115_s1  ;;  %p1122_p10 = scmp.lt.u32.totalorder %s1120_s26, %s1115_s1 }
  0x45   : > { %p1124_p5 = scmp.lt.u32.totalorder %s1115_s1, %s1477_s15 }
  0x46   : > { %p1118_p1 = pnand %p1692_p0, %p1116_p12  ;;  %p1123_p3 = por %p1122_p10, %p1121_p6 }
  0x48   : > { %p1119_p2 = pneg %p1118_p1  ;;  %p1125_p7 = por %p1124_p5, %p1123_p3 }
  0x4a   : > { %p1126_p4 = pnand %p1125_p7, %p1119_p2 }
  0x4c   : > { %1129 = shalt.err (!%p1126_p4)
}
  0x4d   : > { %s1130_s13 = scalar_lea.vmem %s1480_s10, 128  ;;  %s1318_s19 = smov [#allocation2]  }
  0x4e   : > { %p1131_p12 = scmp.ne.s32.totalorder %s1480_s10, %s1130_s13  ;;  %s1135_s22 = sshll.u32 %s1318_s19, 4  ;;  %s1136_s22 = int_to_ptr.vmem [resolvable:$false] %s1135_s22 }
  0x4f   : > { %s1137_s27 = scalar_lea.vmem %s1136_s22, 256  ;;  %p1138_p11 = scmp.lt.s32.totalorder %s1480_s10, %s1136_s22 }
  0x50   : > { %p1133_p1 = pnand %p1131_p12, %p1692_p0  ;;  %p1139_p6 = scmp.lt.s32.totalorder %s1137_s27, %s1130_s13 }
  0x52   : > { %p1134_p8 = pneg %p1133_p1  ;;  %p1140_p10 = por %p1139_p6, %p1138_p11 }
  0x54   : > { %p1141_p3 = pnand %p1140_p10, %p1134_p8 }
  0x56   : > { %1144 = shalt.err (!%p1141_p3)
}
  0x57   : > { %989 = dma.hbm_to_vmem [thread:$0]  (!%p1482_p9), %s1477_s15, 128, %s1480_s10, %s1491_s11  }
  0x58   : > { %s1319_s1 = smov [#allocation8]   ;;  %s1145_s18 = scalar_lea.hbm %s1677_s3, 2048 }
  0x59   : > { %s243_s26 = sshll.u32 %s1319_s1, 4  ;;  %p1146_p4 = scmp.ne.s32.totalorder %s1677_s3, %s1145_s18  ;;  %s244_s26 = int_to_ptr.vmem [resolvable:$true] %s243_s26 }
  0x5a   : > { %p1152_p7 = scmp.lt.u32.totalorder %s1145_s18, %s1677_s3 }
  0x5b   : > { %p1148_p8 = pnand %p1146_p4, %p1435_p13 }
  0x5d   : > { %p1149_p11 = pneg %p1148_p8 }
  0x5f   : > { %p1154_p2 = pnand %p1152_p7, %p1149_p11 }
  0x61   : > { %1157 = shalt.err (!%p1154_p2)
}
  0x62   : > { %s1158_s15 = scalar_lea.vmem %s244_s26, 2048  ;;  %p1166_p6 = scmp.lt.s32.totalorder %s244_s26, %s244_s26 }
  0x63   : > { %p1159_p5 = scmp.ne.s32.totalorder %s244_s26, %s1158_s15  ;;  %p1167_p10 = scmp.lt.s32.totalorder %s1158_s15, %s1158_s15 }
  0x65   : > { %p1161_p12 = pnand %p1159_p5, %p1435_p13  ;;  %p1168_p3 = por %p1167_p10, %p1166_p6 }
  0x67   : > { %p1162_p1 = pneg %p1161_p12 }
  0x69   : > { %p1169_p0 = pnand %p1168_p3, %p1162_p1 }
  0x6b   : > { %1172 = shalt.err (!%p1169_p0)
}
  0x6c   : > { %s1320_s10 = smov 64   ;;  %s1321_s1 = smov 4  }
  0x6d   : > { %p1715_p4 = scmp.ne.s32.totalorder %s1706_s12, 0  ;;  %s293_s18 = scalar_lea.vmem [#allocation7], %s1471_s29 }
  0x6e   : > { %s301_s19 = sshll.u32 %s293_s18, 4  ;;  %s1322_s22 = smov [#allocation9]   ;;  %s1538_s19 = int_to_ptr.vmem [resolvable:$true] %s301_s19 }
  0x6f   : > { %982 = dma.hbm_to_vmem [thread:$0]  (!%p1715_p4), %s1677_s3, 2048, %s244_s26, [#allocation6], %s1320_s10, %s1320_s10, %s1321_s1  }
  0x70   : > { %s260_s13 = sshll.u32 %s1322_s22, 4  ;;  %s1173_s0 = scalar_lea.hbm %s1680_s6, 128  ;;  %s261_s13 = int_to_ptr.vmem [resolvable:$true] %s260_s13 }
  0x71   : > { %p1174_p0 = scmp.ne.s32.totalorder %s1680_s6, %s1173_s0  ;;  %p1180_p7 = scmp.lt.u32.totalorder %s1173_s0, %s1680_s6 }
  0x73   : > { %p1176_p8 = pnand %p1174_p0, %p1435_p13 }
  0x75   : > { %p1177_p11 = pneg %p1176_p8 }
  0x77   : > { %p1182_p2 = pnand %p1180_p7, %p1177_p11 }
  0x79   : > { %1185 = shalt.err (!%p1182_p2)
}
  0x7a   : > { %s1186_s29 = scalar_lea.vmem %s261_s13, 128  ;;  %p1194_p6 = scmp.lt.s32.totalorder %s261_s13, %s261_s13 }
  0x7b   : > { %p1187_p5 = scmp.ne.s32.totalorder %s261_s13, %s1186_s29  ;;  %p1195_p10 = scmp.lt.s32.totalorder %s1186_s29, %s1186_s29 }
  0x7d   : > { %p1189_p12 = pnand %p1187_p5, %p1435_p13  ;;  %p1196_p3 = por %p1195_p10, %p1194_p6 }
  0x7f   : > { %p1190_p1 = pneg %p1189_p12 }
  0x81   : > { %p1197_p9 = pnand %p1196_p3, %p1190_p1 }
  0x83   : > { %1200 = shalt.err (!%p1197_p9)
}
  0x84   : > { %985 = dma.hbm_to_vmem [thread:$0]  (!%p1715_p4), %s1680_s6, 128, %s261_s13, [#allocation10]  }
  0x85   : > { %s1201_s0 = scalar_lea.hbm %s1489_s17, 128  ;;  %p1716_p13 = scmp.ne.s32.totalorder %s1714_s16, 0 }
  0x86   : > { %p1202_p0 = scmp.ne.s32.totalorder %s1489_s17, %s1201_s0  ;;  %s1206_s1 = scalar_lea.hbm %s1676_s2, 256 }
  0x87   : > { %p1717_p8 = pneg %p1716_p13  ;;  %p1207_p9 = scmp.lt.u32.totalorder %s1489_s17, %s1676_s2 }
  0x88   : > { %p1208_p2 = scmp.lt.u32.totalorder %s1206_s1, %s1201_s0  ;;  %p1210_p12 = scmp.lt.u32.totalorder %s1201_s0, %s1489_s17 }
  0x89   : > { %p1204_p11 = pnand %p1202_p0, %p1717_p8 }
  0x8a   : > { %p1209_p5 = por %p1208_p2, %p1207_p9 }
  0x8b   : > { %p1205_p7 = pneg %p1204_p11 }
  0x8c   : > { %p1211_p1 = por %p1210_p12, %p1209_p5 }
  0x8e   : > { %p1212_p6 = pnand %p1211_p1, %p1205_p7 }
  0x90   : > { %1215 = shalt.err (!%p1212_p6)
}
  0x91   : > { %s1216_s18 = scalar_lea.vmem %s1538_s19, 128  ;;  %p1718_p10 = pmov %p1717_p8 }
  0x92   : > { %p1217_p4 = scmp.ne.s32.totalorder %s1538_s19, %s1216_s18  ;;  %s1323_s22 = smov [#allocation7]  }
  0x93   : > { %s1221_s13 = sshll.u32 %s1323_s22, 4  ;;  %s1222_s13 = int_to_ptr.vmem [resolvable:$false] %s1221_s13 }
  0x94   : > { %p1219_p3 = pnand %p1217_p4, %p1718_p10  ;;  %s1223_s27 = scalar_lea.vmem %s1222_s13, 256 }
  0x95   : > { %p1224_p8 = scmp.lt.s32.totalorder %s1538_s19, %s1222_s13  ;;  %p1225_p11 = scmp.lt.s32.totalorder %s1223_s27, %s1216_s18 }
  0x96   : > { %p1220_p0 = pneg %p1219_p3 }
  0x97   : > { %p1226_p9 = por %p1225_p11, %p1224_p8 }
  0x99   : > { %p1227_p2 = pnand %p1226_p9, %p1220_p0 }
  0x9b   : > { %1230 = shalt.err (!%p1227_p2)
}
  0x9c   : > { %992 = dma.hbm_to_vmem [thread:$0]  (!%p1716_p13), %s1489_s17, 128, %s1538_s19, %s1491_s11  }
  0x9d   : > { %p1719_p7 = scmp.ne.s32.totalorder %s1705_s9, 0 }
  0x9e   : > { %s319_s15 = sand.u32 (!%p1719_p7), 1, %s1387_s28   ;;  %s321_s23 = sand.u32 (!%p1719_p7), 1, %s1305_s25  }
  0x9f   : > { %317 = sbr.rel (%p1719_p7) target bundleno = 1000 (0x3e8), region = 48  ;;  %s1588_s26 = sshll.u32 (!%p1719_p7), %s321_s23, 3 }
  0xa0   : > { %s320_s29 = scalar_lea.sflag (!%p1719_p7), [#allocation3], %s319_s15  ;;  %s323_s24 = scalar_lea.vmem (!%p1719_p7), [#allocation2], %s1588_s26 }
  0xa1   : > { %p1720_p5 = scmp.ne.s32.totalorder (!%p1719_p7), %s1702_s30, 0 }
  0xa6   : > { %1276 = dma.done.wait (%p1720_p5), %s320_s29, 128  }
  0xa7   : > { %1278 = vsyncadd (%p1720_p5), %s320_s29, 4294967168  ;;  %p1721_p13 = scmp.eq.s32.totalorder %s1387_s28, 0 }
  0xa9   : > { %1280 = dma.done.wait (%p1721_p13), [#allocation6], 2048   ;;  %p1722_p12 = pmov %p1721_p13 }
  0xaa   : > { %s336_s9 = scalar_lea.vmem [#allocation7], %s1588_s26 }
  0xab   : > { %1282 = vsyncadd (%p1722_p12), [#allocation6], 4294965248 }
  0xac   : > { %1284 = dma.done.wait (%p1720_p5), %s320_s29, 128  }
  0xad   : > { %1286 = vsyncadd (%p1720_p5), %s320_s29, 4294967168  ;;  %p1723_p1 = pmov %p1722_p12 }
  0xaf   : > { %1288 = dma.done.wait (%p1723_p1), [#allocation6], 2048   ;;  %p1724_p6 = pmov %p1723_p1 }
  0xb0   : > { %p1725_p4 = pmov %p1723_p1 }
  0xb1   : > { %1290 = vsyncadd (%p1724_p6), [#allocation6], 4294965248 }
  0xb2   : > { %1292 = dma.done.wait (%p1725_p4), [#allocation10], 128   ;;  %p1726_p10 = pmov %p1723_p1 }
  0xb3   : > { %v1324_v0 = vmov 0   ;;  %v1045_v1 = vld [vmem:[#allocation5 + $0x4] ss:$8 sps:$4 sm:$0xff]   ;;  %v1047_v2 = vld [vmem:[#allocation5] ss:$8 sps:$4 sm:$0xff]   ;;  %v1069_v10 = vld [vmem:[#allocation8 + $0x40] sm:$0xff]  }
  0xb4   : > { %1294 = vsyncadd (%p1726_p10), [#allocation10], 4294967168  ;;  %522 = vmatprep.mubr.bf16.mxu0 %v1324_v0  ;;  %490 = vmatprep.subr.bf16.mxu0 %v1045_v1  ;;  %v1048_v3 = vld [vmem:[#allocation5 + $0x14] ss:$8 sps:$4 sm:$0xff]   ;;  %v1050_v4 = vld [vmem:[#allocation5 + $0x10] ss:$8 sps:$4 sm:$0xff]  }
  0xb5   : > { %491 = vmatpush1.bf16.msra.mxu0 %v1047_v2  ;;  %v1051_v5 = vld [vmem:[#allocation5 + $0x24] ss:$8 sps:$4 sm:$0xff]   ;;  %v1053_v6 = vld [vmem:[#allocation5 + $0x20] ss:$8 sps:$4 sm:$0xff]   ;;  %v1054_v7 = vld [vmem:[#allocation5 + $0x34] ss:$8 sps:$4 sm:$0xff]   ;;  %936 = vmatprep.subr.bf16.mxu1 %v1069_v10 }
  0xb6   : > { %492 = vmatprep.subr.bf16.mxu0 %v1048_v3  ;;  %v1056_v8 = vld [vmem:[#allocation5 + $0x30] ss:$8 sps:$4 sm:$0xff]   ;;  %v1057_v9 = vld [vmem:[#allocation5 + $0x44] ss:$8 sps:$4 sm:$0xff]   ;;  %v1059_v12 = vld [vmem:[#allocation5 + $0x40] ss:$8 sps:$4 sm:$0xff]  }
  0xb7   : > { %v1070_v11 = vld [vmem:[#allocation8] sm:$0xff]   ;;  %v1071_v13 = vld [vmem:[#allocation8 + $0x48] sm:$0xff]   ;;  %v1073_v15 = vld [vmem:[#allocation8 + $0x50] sm:$0xff]   ;;  %p384_p3 = scmp.lt.s32.totalorder %s1387_s28, 1  ;;  %s932_s21 = sshll.u32 %s1387_s28, 7 }
  0xb8   : > { %937 = vmatpush3.bf16.msra.mxu1 %v1070_v11  ;;  %v1072_v14 = vld [vmem:[#allocation8 + $0x8] sm:$0xff]   ;;  %v1074_v18 = vld [vmem:[#allocation8 + $0x10] sm:$0xff]   ;;  %v1075_v19 = vld [vmem:[#allocation8 + $0x58] sm:$0xff]   ;;  %s383_s10 = scalar_lea.vmem [#allocation11], %s1588_s26  ;;  %s1629_s18 = scalar_lea.hbm %s1681_s7, %s932_s21 }
  0xb9   : > { %493 = vmatpush1.bf16.msra.mxu0 %v1050_v4  ;;  %938 = vmatprep.subr.bf16.mxu1 %v1071_v13  ;;  %v1060_v16 = vld [vmem:[#allocation5 + $0x54] ss:$8 sps:$4 sm:$0xff]   ;;  %v1062_v17 = vld [vmem:[#allocation5 + $0x50] ss:$8 sps:$4 sm:$0xff]   ;;  %v1063_v20 = vld [vmem:[#allocation5 + $0x64] ss:$8 sps:$4 sm:$0xff]  }
  0xba   : > { %494 = vmatprep.subr.bf16.mxu0 %v1051_v5  ;;  %v1065_v21 = vld [vmem:[#allocation5 + $0x60] ss:$8 sps:$4 sm:$0xff]   ;;  %v1066_v22 = vld [vmem:[#allocation5 + $0x74] ss:$8 sps:$4 sm:$0xff]   ;;  %v1068_v26 = vld [vmem:[#allocation5 + $0x70] ss:$8 sps:$4 sm:$0xff]  }
  0xbb   : > { %v1076_v23 = vld [vmem:[#allocation8 + $0x18] sm:$0xff]   ;;  %v1077_v24 = vld [vmem:[#allocation8 + $0x60] sm:$0xff]   ;;  %v1079_v28 = vld [vmem:[#allocation8 + $0x68] sm:$0xff]   ;;  %s385_s30 = scalar_select %p384_p3, %s1387_s28, 1 }
  0xbc   : > { %939 = vmatpush3.bf16.msra.mxu1 %v1072_v14  ;;  %v1078_v25 = vld [vmem:[#allocation8 + $0x20] sm:$0xff]   ;;  %v1080_v30 = vld [vmem:[#allocation8 + $0x28] sm:$0xff]   ;;  %v1081_v31 = vld [vmem:[#allocation8 + $0x70] sm:$0xff]   ;;  %s749_s1 = sshll.u32 %s383_s10, 4  ;;  %s736_s22 = scalar_lea.sflag [#allocation4], %s321_s23  ;;  %s1631_s1 = int_to_ptr.vmem [resolvable:$true] %s749_s1 }
  0xbd   : > { %495 = vmatpush1.bf16.msra.mxu0 %v1053_v6  ;;  %940 = vmatprep.subr.bf16.mxu1 %v1073_v15  ;;  %v389_v27 = vld [vmem:[%s323_s24] sm:$0xff]  ;;  %v1082_v32 = vld [vmem:[#allocation8 + $0x30] sm:$0xff]   ;;  %v1083_v33 = vld [vmem:[#allocation8 + $0x78] sm:$0xff]   ;;  %s898_s16 = sshll.u32 %s385_s30, 2  ;;  %s1231_s13 = scalar_lea.vmem %s1631_s1, 128 }
  0xbe   : > { %496 = vmatprep.subr.bf16.mxu0 %v1054_v7  ;;  %v390_v29 = vpack.c.bf16 %v389_v27, %v389_v27  ;;  %v1084_v34 = vld [vmem:[#allocation8 + $0x38] sm:$0xff]   ;;  %s387_s19 = scalar_lea.vmem %s1678_s4, %s898_s16  ;;  %v730_v13 = vld [vmem:[%s1679_s5] sm:$0xff]  ;;  %p1232_p0 = scmp.ne.s32.totalorder %s1631_s1, %s1231_s13 }
  0xbf   : > { %v407_v35 = vld [vmem:[%s336_s9] sm:$0xff]  ;;  %v567_v48 = vld [vmem:[%s387_s19] sm:$0xf]  ;;  %p1727_p8 = scmp.ne.s32.totalorder %s1712_s20, 0  ;;  %s1325_s28 = smov [#allocation11]  }
  0xc0   : > { %941 = vmatpush3.bf16.msra.mxu1 %v1074_v18  ;;  %v408_v36 = vunpack.c.l.bf16 %v407_v35  ;;  %v409_v37 = vunpack.c.h.bf16 %v407_v35  ;;  %v568_v50 = vunpack.c.l.bf16 %v567_v48  ;;  %v732_v15 = vld [vmem:[#allocation9] sm:$0xff]  ;;  %s1235_s27 = sshll.u32 %s1325_s28, 4  ;;  %s1236_s27 = int_to_ptr.vmem [resolvable:$false] %s1235_s27 }
  0xc1   : > { %497 = vmatpush1.bf16.msra.mxu0 %v1056_v8  ;;  %942 = vmatprep.subr.bf16.mxu1 %v1075_v19  ;;  %p1233_p11 = pnand %p1232_p0, %p1727_p8  ;;  %s1237_s15 = scalar_lea.vmem %s1236_s27, 256 }
  0xc2   : > { %498 = vmatprep.subr.bf16.mxu0 %v1057_v9  ;;  %p1238_p2 = scmp.lt.s32.totalorder %s1631_s1, %s1236_s27  ;;  %p1239_p7 = scmp.lt.s32.totalorder %s1237_s15, %s1231_s13 }
  0xc3   : > { %p1234_p9 = pneg %p1233_p11 }
  0xc4   : > { %943 = vmatpush3.bf16.msra.mxu1 %v1076_v23  ;;  %p1240_p5 = por %p1239_p7, %p1238_p2 }
  0xc5   : > { %499 = vmatpush1.bf16.msra.mxu0 %v1059_v12  ;;  %944 = vmatprep.subr.bf16.mxu1 %v1077_v24 }
  0xc6   : > { %500 = vmatprep.subr.bf16.mxu0 %v1060_v16  ;;  %p1241_p13 = pnand %p1240_p5, %p1234_p9 }
  0xc8   : > { %945 = vmatpush3.bf16.msra.mxu1 %v1078_v25 }
  0xc9   : > { %501 = vmatpush1.bf16.msra.mxu0 %v1062_v17  ;;  %946 = vmatprep.subr.bf16.mxu1 %v1079_v28 }
  0xca   : > { %502 = vmatprep.subr.bf16.mxu0 %v1063_v20 }
  0xcc   : > { %947 = vmatpush3.bf16.msra.mxu1 %v1080_v30 }
  0xcd   : > { %503 = vmatpush1.bf16.msra.mxu0 %v1065_v21  ;;  %948 = vmatprep.subr.bf16.mxu1 %v1081_v31 }
  0xce   : > { %504 = vmatprep.subr.bf16.mxu0 %v1066_v22 }
  0xd0   : > { %949 = vmatpush3.bf16.msra.mxu1 %v1082_v32 }
  0xd1   : > { %505 = vmatpush1.bf16.msra.mxu0 %v1068_v26  ;;  %950 = vmatprep.subr.bf16.mxu1 %v1083_v33 }
  0xd4   : > { %523 = vmatmul.mubr.bf16.vlgmr.msra.gmra.mrb[0].mxu0 %v390_v29  ;;  %951 = vmatpush3.bf16.msra.mxu1 %v1084_v34 }
 0x1a7   : > { %v524_v38 = vpop.f32.mrb[0].mxu0 }
 0x1a8   : > { %v525_v39 = vadd.f32 %v524_v38, %v408_v36  ;;  %v526_v40 = vpop.f32.mrb[1].mxu0 }
 0x1a9   : > { %v527_v41 = vadd.f32 %v526_v40, %v409_v37  ;;  %v528_v42 = vpop.f32.mrb[2].mxu0 }
 0x1aa   : > { %v531_v43 = vmax.f32 %v525_v39, 0.0  ;;  %v529_v44 = vpop.f32.mrb[3].mxu0 }
 0x1ab   : > { %v532_v45 = vmax.f32 %v527_v41, 0.0 }
 0x1ac   : > { %v533_v47 = vpack.c.bf16 %v531_v43, %v531_v43 }
 0x1ad   : > { %v534_v46 = vpack.c.bf16 %v532_v45, %v532_v45 }
 0x1af   : > { %697 = vmatprep.mubr.bf16.mxu1 %v534_v46 }
 0x1b0   : > { %698 = vmatmul.mubr.bf16.vlgmr.msra.gmra.mrb[0].mxu1 %v533_v47 }
 0x283   : > { %v952_v49 = vpop.f32.mrb[0].mxu1 }
 0x284   : > { %v953_v51 = vpop.f32.mrb[1].mxu1 }
 0x285   : > { %v954_v52 = vadd.f32 %v953_v51, %v952_v49  ;;  %v955_v53 = vpop.f32.mrb[2].mxu1 }
 0x286   : > { %v956_v54 = vpop.f32.mrb[3].mxu1 }
 0x287   : > { %v700_v55 = vadd.f32 %v954_v52, %v568_v50 }
 0x289   : > { %v705_v56 = vadd.f32 %v700_v55, %v389_v27 }
 0x28b   : > { %706 = vadd.xlane.f32.xlu0 %v705_v56 }
 0x318   : > { %v707_v57 = vpop.xlane.xlu0 %706 }
 0x319   : > { %v708_v58 = vrot.slane %v707_v57, 4 }
 0x31b   : > { %v709_v59 = vadd.f32 %v708_v58, %v707_v57 }
 0x31d   : > { %v710_v60 = vrot.slane %v709_v59, 2 }
 0x31f   : > { %v711_v61 = vadd.f32 %v710_v60, %v709_v59 }
 0x321   : > { %v712_v62 = vrot.slane %v711_v61, 1 }
 0x323   : > { %v713_v63 = vadd.f32 %v712_v62, %v711_v61 }
 0x325   : > { %v715_v0 = vmul.f32 0.0009765625, %v713_v63 }
 0x327   : > { %v716_v1 = vsub.f32 %v705_v56, %v715_v0 }
 0x329   : > { %v717_v2 = vmul.f32 %v716_v1, %v716_v1 }
 0x32b   : > { %718 = vadd.xlane.f32.xlu0 %v717_v2 }
 0x3b8   : > { %v719_v3 = vpop.xlane.xlu0 %718 }
 0x3b9   : > { %v720_v4 = vrot.slane %v719_v3, 4 }
 0x3bb   : > { %v721_v5 = vadd.f32 %v720_v4, %v719_v3 }
 0x3bd   : > { %v722_v6 = vrot.slane %v721_v5, 2 }
 0x3bf   : > { %v723_v7 = vadd.f32 %v722_v6, %v721_v5 }
 0x3c1   : > { %v724_v8 = vrot.slane %v723_v7, 1 }
 0x3c3   : > { %v725_v9 = vadd.f32 %v724_v8, %v723_v7 }
 0x3c5   : > { %v726_v10 = vmul.f32 0.0009765625, %v725_v9 }
 0x3c7   : > { %v727_v11 = vadd.f32 1e-05, %v726_v10 }
 0x3c9   : > { %1085 = vrsqrt.f32 %v727_v11 }
 0x3d3   : > { %v1086_v12 = vpop.eup %1085 }
 0x3d4   : > { %v729_v14 = vmul.f32 %v1086_v12, %v716_v1 }
 0x3d6   : > { %v731_v16 = vmul.f32 %v730_v13, %v729_v14 }
 0x3d8   : > { %v733_v17 = vadd.f32 %v732_v15, %v731_v16 }
 0x3da   : > { %734 = vst [vmem:[%s383_s10] sm:$0xff] %v733_v17 }
 0x3db   : > { %1244 = shalt.err (!%p1241_p13)
}
 0x3dc   : > { %s1245_s23 = scalar_lea.hbm %s1629_s18, 128  ;;  %s1249_s24 = scalar_lea.hbm %s1681_s7, 256 }
 0x3dd   : > { %p1246_p12 = scmp.ne.s32.totalorder %s1629_s18, %s1245_s23  ;;  %p1250_p4 = scmp.lt.u32.totalorder %s1629_s18, %s1681_s7 }
 0x3de   : > { %p1251_p10 = scmp.lt.u32.totalorder %s1249_s24, %s1245_s23  ;;  %p1253_p0 = scmp.lt.u32.totalorder %s1245_s23, %s1629_s18 }
 0x3df   : > { %p1247_p1 = pnand %p1246_p12, %p1727_p8 }
 0x3e0   : > { %p1252_p3 = por %p1251_p10, %p1250_p4 }
 0x3e1   : > { %p1248_p6 = pneg %p1247_p1 }
 0x3e2   : > { %p1254_p11 = por %p1253_p0, %p1252_p3 }
 0x3e4   : > { %p1255_p9 = pnand %p1254_p11, %p1248_p6 }
 0x3e6   : > { %1258 = shalt.err (!%p1255_p9)
}
 0x3e7   : > { %974 = dma.vmem_to_hbm [thread:$0]  (%p1727_p8), %s1631_s1, 128, %s1629_s18, %s736_s22  }
 0x3e8 PF: > { %s1728_s16 = sld [smem:[#allocation18_spill]]  ;;  %s1729_s17 = sld [smem:[#allocation21_spill]] }
 0x3e9   : > { %s1730_s11 = sld [smem:[#allocation20_spill]] }
 0x3ee   : > { %s761_s19 = sand.u32 1, %s1728_s16   ;;  %p1731_p2 = scmp.ne.s32.totalorder %s1729_s17, 0 }
 0x3ef   : > { %p1732_p7 = scmp.ge.s32.totalorder %s1730_s11, 2  ;;  %s762_s8 = scalar_lea.sflag [#allocation4], %s761_s19 }
 0x3f1   : > { %p994_p5 = pnand %p1732_p7, %p1731_p2 }
 0x3f3   : > { %1296 = dma.done.wait (!%p994_p5), %s762_s8, 128  }
 0x3f4   : > { %1298 = vsyncadd (!%p994_p5), %s762_s8, 4294967168  ;;  %s1733_s27 = sld [smem:[#allocation22_spill]]  ;;  %s1734_s0 = sld [smem:[#allocation19_spill]] }
 0x3f5   : > { %s1735_s26 = sld [smem:[#allocation23_spill]]  ;;  %s1736_s24 = smov %s1305_s25 }
 0x3fa   : > { %p22_p13 = scmp.ge.s32.totalorder %s1733_s27, 4   ;;  %s1737_s25 = smov %s1734_s0 }
 0x3fc   :  { %24 = sbr.rel (!%p22_p13) target bundleno = 10 (0xa), region = 119 }
 0x403   :  { %767 = vsyncpa [#allocation3], 1 }
 0x404   :  { %769 = vsyncpa [#allocation3 + $0x1], 1 }
 0x405   :  { %770 = vsyncpa [#allocation6], 1 }
 0x406   :  { %771 = vsyncpa [#allocation10], 1 }
 0x407   :  { %772 = vsyncpa [#allocation4], 1 }
 0x408   :  { %774 = vsyncpa [#allocation4 + $0x1], 1 }

</bundles_post_ra>
